<compile_context>
chip_gen: v6e
topology: v6e:2x2x1
jax: 0.10.0
libtpu: 0.0.40
codegen_flags: <defaults>
</compile_context>

<pallas_src>
import jax
import jax.numpy as jnp
from jax.experimental import pallas as pl
from jax.experimental.pallas import tpu as pltpu


_LANE_CAP = 1024          # widest lane-dense 2D view attempted (multiple of 128)
_SUBLANE_MULT = 32        # dtype-agnostic sublane multiple (f32/bf16/int8 packing)
_MIN_GRID_STEPS = 8       # ~ 2 TensorCores x pipeline depth: keeps v7x megacore busy
_SPLIT_BYTES = 4 << 20    # arrays larger than this never run as a single grid step
_VMEM_HEADROOM = 2 << 20  # slack kept below the scoped VMEM limit


def _tpu_generation_params():
    """(target_block_bytes, vmem_limit_bytes) tuned per TPU generation."""
    kind = ""
    try:
        kind = jax.devices()[0].device_kind.lower()
    except Exception:
        pass
    if "v7" in kind:
        # 64 MiB physical VMEM, 3.2 TB/s HBM: 8 MiB blocks amortize the
        # ~0.35 us per-step overhead; 4 x 8 MiB double-buffered copies < 48 MiB.
        return 8 << 20, 48 << 20
    if "v6" in kind or "v5p" in kind:
        # 128 MiB physical VMEM; default scoped limit is 32 MiB, so raise it
        # to cover 2x(in+out) buffers of 8 MiB each.
        return 8 << 20, 64 << 20
    if "v5" in kind:
        # v5e: 16 MiB default scoped VMEM is the tight budget; 2 MiB blocks are
        # already <8% per-step overhead at 0.82 TB/s.  Still raise the limit so
        # widening lambdas (4 x 2 MiB worst case on the wider dtype) are safe.
        return 2 << 20, 32 << 20
    # Unknown device: conservative.
    return 4 << 20, 32 << 20


def _make_lambda_kernel(lambd, out_dtype):
    """Pallas kernel body: apply `lambd` elementwise to each VMEM tile."""
    # NOTE: the binding resource is HBM/DMA bandwidth, not a VLIW slot, so the
    # body stays a plain elementwise apply.
    def kernel(x_ref, o_ref):
        o_ref[...] = lambd(x_ref[...]).astype(out_dtype)
    return kernel


def _choose_lane(total):
    """Widest multiple of 128 (<= _LANE_CAP) dividing `total`, else None."""
    lane = min(_LANE_CAP, (total // 128) * 128)
    while lane >= 128:
        if total % lane == 0:
            return lane
        lane -= 128
    return None


def _suffix_lane(shape):
    """Suffix product of dims (>=128 lanes when possible).

    Collapsing contiguous trailing dims keeps the reshape a zero-copy view and
    a block whose lane dim equals the full array dim is always legal, even when
    it is not a multiple of 128 (masked partial stores on the tail lanes).
    """
    lane = 1
    for d in reversed(shape):
        lane *= d
        if lane >= 128:
            break
    return lane


def lambda_layer_pallas(x, lambd):
    """LambdaLayer.forward: apply an elementwise JAX-traceable `lambd` via Pallas."""
    orig_shape = x.shape
    total = int(x.size)

    # Derive output dtype (and sanity-check the lambda is shape-preserving).
    out_aval = jax.eval_shape(lambd, jax.ShapeDtypeStruct(x.shape, x.dtype))
    out_dtype = out_aval.dtype
    if out_aval.shape != orig_shape:
        # TODO(synk): shape-changing / non-elementwise lambdas each need their
        # own BlockSpec/index_map design; only the elementwise case is covered.
        raise NotImplementedError("only elementwise (shape-preserving) lambdas supported")

    if total == 0:
        return lambd(x)  # empty tensor: nothing to tile

    in_itemsize = jnp.dtype(x.dtype).itemsize
    out_itemsize = jnp.dtype(out_dtype).itemsize
    max_itemsize = max(in_itemsize, out_itemsize)  # budget on the WIDER dtype

    target_block_bytes, vmem_limit = _tpu_generation_params()

    # ---- lane-dense 2D view; zero-copy in every case ------------------------
    lane = _choose_lane(total)
    if lane is None:
        # Ragged element count (not a multiple of 128): collapse a suffix of
        # dims into the lane axis instead of edge-pad + trailing-slice (which
        # cost two extra full HBM passes on a mem-bound op).
        lane = _suffix_lane(orig_shape)
    rows = total // lane
    x2d = x.reshape(rows, lane)  # contiguous collapse -> no data movement

    # ---- block sizing --------------------------------------------------------
    max_rows = max(
        _SUBLANE_MULT,
        (target_block_bytes // (lane * max_itemsize)) // _SUBLANE_MULT * _SUBLANE_MULT,
    )
    block_rows = rows if rows <= max_rows else max_rows

    # Never let a multi-MiB array collapse to one or two grid steps: "parallel"
    # only shards across grid steps (v7x has 2 TensorCores) and a single step
    # also disables DMA/compute pipelining on v5e/v6e.
    if rows * lane * max_itemsize >= _SPLIT_BYTES and rows >= _MIN_GRID_STEPS * _SUBLANE_MULT:
        cap = max(
            _SUBLANE_MULT,
            (pl.cdiv(rows, _MIN_GRID_STEPS) // _SUBLANE_MULT) * _SUBLANE_MULT,
        )
        block_rows = min(block_rows, cap)

    # 2 x (input + output) double-buffered copies must fit the scoped VMEM limit.
    block_bytes = 2 * block_rows * lane * (in_itemsize + out_itemsize)
    if block_bytes > vmem_limit - _VMEM_HEADROOM:
        # TODO(synk): pathologically wide rows (huge ragged trailing dim) would
        # need a manual-DMA path; plain JAX keeps the module semantics.
        return lambd(x)

    grid = (pl.cdiv(rows, block_rows),)

    # NOTE: if rows % block_rows != 0 the tail of the last input tile holds
    # unspecified VMEM data; results there are discarded, which is fine for
    # pure elementwise lambdas.
    out2d = pl.pallas_call(
        _make_lambda_kernel(lambd, out_dtype),
        out_shape=jax.ShapeDtypeStruct((rows, lane), out_dtype),
        grid_spec=pltpu.PrefetchScalarGridSpec(
            num_scalar_prefetch=0,
            grid=grid,
            in_specs=[pl.BlockSpec((block_rows, lane), lambda i: (i, 0))],
            out_specs=pl.BlockSpec((block_rows, lane), lambda i: (i, 0)),
        ),
        compiler_params=pltpu.CompilerParams(
            dimension_semantics=("parallel",),
            vmem_limit_bytes=vmem_limit,
        ),
    )(x2d)

    return out2d.reshape(orig_shape)


if __name__ == "__main__":
    key = jax.random.PRNGKey(0)

    # NCHW input, as the PyTorch module would see.
    x = jax.random.normal(key, (2, 4, 16, 16), dtype=jnp.float32)
    lambd = lambda t: t * 2.0 + 1.0

    out = jax.block_until_ready(lambda_layer_pallas(x, lambd))
    ref = lambd(x)
    assert out.shape == ref.shape and out.dtype == ref.dtype
    assert jnp.allclose(out, ref, atol=1e-6, rtol=1e-6)

    # dtype-widening lambda (bf16 -> f32): exercises wider-dtype VMEM budgeting.
    xb = x.astype(jnp.bfloat16)
    widen = lambda t: t.astype(jnp.float32) * 0.5
    outw = jax.block_until_ready(lambda_layer_pallas(xb, widen))
    refw = widen(xb)
    assert outw.dtype == refw.dtype and jnp.allclose(outw, refw)

    # ragged element count (2*3*5*5 = 150, not a multiple of 128): suffix-lane path.
    xr = jax.random.normal(jax.random.PRNGKey(1), (2, 3, 5, 5), dtype=jnp.float32)
    outr = jax.block_until_ready(lambda_layer_pallas(xr, lambd))
    assert jnp.allclose(outr, lambd(xr), atol=1e-6, rtol=1e-6)

    print("KERNEL_OK")
</pallas_src>

<mosaic_0001>
module attributes {stable_mosaic.version = 11 : i64} {
  func.func @kernel(%arg0: i32, %arg1: memref<2x1024xf32, #tpu.memory_space<vmem>>, %arg2: memref<2x1024xf32, #tpu.memory_space<vmem>>) attributes {dimension_semantics = [#tpu.dimension_semantics<parallel>], iteration_bounds = array<i64: 1>, scalar_prefetch = 0 : i64, scratch_operands = 0 : i64, tpu.core_type = #tpu.core_type<tc>, window_params = [{transform_indices = @transform_0, window_bounds = array<i64: 2, 1024>}, {transform_indices = @transform_1, window_bounds = array<i64: 2, 1024>}]} {
    %c0 = arith.constant 0 : index
    %c0_0 = arith.constant 0 : index
    %0 = vector.load %arg1[%c0, %c0_0] : memref<2x1024xf32, #tpu.memory_space<vmem>>, vector<2x1024xf32>
    %cst = arith.constant 2.000000e+00 : f32
    %1 = vector.broadcast %cst : f32 to vector<2x1024xf32>
    %2 = arith.mulf %0, %1 : vector<2x1024xf32>
    %cst_1 = arith.constant 1.000000e+00 : f32
    %3 = vector.broadcast %cst_1 : f32 to vector<2x1024xf32>
    %4 = arith.addf %2, %3 : vector<2x1024xf32>
    %c0_2 = arith.constant 0 : index
    %c0_3 = arith.constant 0 : index
    %5 = vector.load %arg2[%c0_2, %c0_3] : memref<2x1024xf32, #tpu.memory_space<vmem>>, vector<2x1024xf32>
    tpu.vector_store %arg2[%c0_2, %c0_3], %4 {strides = array<i32>} : memref<2x1024xf32, #tpu.memory_space<vmem>>, vector<2x1024xf32>,
    return
  }
  func.func @transform_0(%arg0: i32) -> (i32, i32) {
    %c0_i32 = arith.constant 0 : i32
    %c0_i32_0 = arith.constant 0 : i32
    return %arg0, %c0_i32 : i32, i32
  }
  func.func @transform_1(%arg0: i32) -> (i32, i32) {
    %c0_i32 = arith.constant 0 : i32
    %c0_i32_0 = arith.constant 0 : i32
    return %arg0, %c0_i32 : i32, i32
  }
}

</mosaic_0001>

<bundles_post_ra>
// kernel: tpu_custom_call.1
= control target key start
LH: loop header
LB: loop body
LE: loop exit
PB: predicated region body
PF: predicated region fallthrough
CT: control target
= control target key end

     0   :  { %6 = vsyncpa [#allocation3], 0  ;;  %s108_s0 = inlined_call_operand.hbm [shape: f32[2,1024], index: 0, kind: input, shape index: {}]   ;;  %s109_s1 = inlined_call_operand.hbm [shape: f32[2,1024], index: 1, kind: output, shape index: {}]  }
   0x1   :  { %7 = vsyncpa [#allocation4], 0  ;;  %s90_s6 = smov [#allocation2]  }
   0x2   :  { %s14_s7 = sshll.u32 %s90_s6, 4  ;;  %s15_s7 = int_to_ptr.vmem [resolvable:$true] %s14_s7 }
   0x3   :  { %s54_s8 = scalar_lea.vmem %s15_s7, 256  ;;  %p59_p1 = scmp.lt.s32.totalorder %s15_s7, %s15_s7 }
   0x4   :  { %p55_p0 = scmp.ne.s32.totalorder %s15_s7, %s54_s8  ;;  %p60_p2 = scmp.lt.s32.totalorder %s54_s8, %s54_s8 }
   0x6   :  { %p61_p3 = por %p60_p2, %p59_p1 }
   0x8   :  { %p62_p4 = pnand %p61_p3, %p55_p0 }
   0xa   :  { %65 = shalt.err (!%p62_p4)
}
   0xb   :  { %17 = dma.hbm_to_vmem [thread:$0]  %s108_s0, 256, %s15_s7, [#allocation3]  }
   0xc   :  { %86 = dma.done.wait [#allocation3], 256  }
   0xd   :  { %87 = vsyncadd [#allocation3], 4294967040  ;;  %v21_v0 = vld [vmem:[#allocation2] sm:$0xff]  ;;  %v22_v1 = vld [vmem:[#allocation2 + $0x8] sm:$0xff]  ;;  %s91_s11 = smov [#allocation5]  }
   0xe   :  { %s35_s12 = sshll.u32 %s91_s11, 4  ;;  %v23_v2 = vmul.f32 2.0, %v21_v0  ;;  %v24_v3 = vmul.f32 2.0, %v22_v1  ;;  %s36_s12 = int_to_ptr.vmem [resolvable:$true] %s35_s12 }
   0xf   :  { %s66_s13 = scalar_lea.vmem %s36_s12, 256  ;;  %p71_p6 = scmp.lt.s32.totalorder %s36_s12, %s36_s12 }
  0x10   :  { %v25_v4 = vadd.f32 1.0, %v23_v2  ;;  %v26_v5 = vadd.f32 1.0, %v24_v3  ;;  %p67_p5 = scmp.ne.s32.totalorder %s36_s12, %s66_s13  ;;  %p72_p7 = scmp.lt.s32.totalorder %s66_s13, %s66_s13 }
  0x12   :  { %27 = vst [vmem:[#allocation5] sm:$0xff] %v25_v4  ;;  %28 = vst [vmem:[#allocation5 + $0x8] sm:$0xff] %v26_v5  ;;  %p73_p8 = por %p72_p7, %p71_p6 }
  0x14   :  { %p74_p9 = pnand %p73_p8, %p67_p5 }
  0x16   :  { %77 = shalt.err (!%p74_p9)
}
  0x17   :  { %38 = dma.vmem_to_hbm [thread:$0]  %s36_s12, 256, %s109_s1, [#allocation4]  }
  0x18   :  { %88 = dma.done.wait [#allocation4], 256  }
  0x19   :  { %89 = vsyncadd [#allocation4], 4294967040 }
  0x1a   :  { %42 = vsyncpa [#allocation3], 1 }
  0x1b   :  { %43 = vsyncpa [#allocation4], 1 }

</bundles_post_ra>
